<compile_context>
chip_gen: v7x
topology: tpu7x:2x2x1
jax: 0.10.0
libtpu: 0.0.40
codegen_flags: <defaults>
</compile_context>

<pallas_src>
import jax
import jax.numpy as jnp
from jax.experimental import pallas as pl
from jax.experimental.pallas import tpu as pltpu


# ----------------------------------------------------------------------------
# Pallas kernel: fused attention for a block of BB batch rows.
# ----------------------------------------------------------------------------
def _attention_kernel(dec_ref, feat_ref, wphi_ref, bphi_ref, wpsi_ref, bpsi_ref,
                      score_ref, ctx_ref):
    BB, T, D = feat_ref.shape
    H = wpsi_ref.shape[1]

    dec = dec_ref[...].reshape(BB, D)            # (BB, D)    bf16
    feat = feat_ref[...]                         # (BB, T, D) bf16

    # phi(decoder_state) + relu -> queries (BB, H), f32 accumulation on the MXU.
    q = jnp.dot(dec, wphi_ref[...], preferred_element_type=jnp.float32) + bphi_ref[...]
    q = jnp.maximum(q, 0.0)

    # psi(listener_feat) + relu -> keys: ONE (BB*T, D) x (D, H) MXU matmul over all rows.
    k = jnp.dot(feat.reshape(BB * T, D), wpsi_ref[...],
                preferred_element_type=jnp.float32) + bpsi_ref[...]
    k = jnp.maximum(k, 0.0).reshape(BB, T, H)    # (BB, T, H) f32

    # energy[b, 0, t] = sum_h q[b, h] * k[b, t, h]   (batched contraction over H)
    energy = jnp.einsum("bqh,bth->bqt", q.reshape(BB, 1, H), k,
                        preferred_element_type=jnp.float32)        # (BB, 1, T)

    # numerically-stable softmax over T (kept in f32); 1/s goes to the EUP.
    m = jnp.max(energy, axis=-1, keepdims=True)
    e = jnp.exp(energy - m)
    s = jnp.sum(e, axis=-1, keepdims=True)
    score = e * pl.reciprocal(s, approx=True)                       # (BB, 1, T)

    # context = score @ listener_feat (batched) -> (BB, 1, D), bf16 operands, f32 acc.
    ctx = jnp.einsum("bqt,btd->bqd", score.astype(feat.dtype), feat,
                     preferred_element_type=jnp.float32)

    score_ref[...] = score
    ctx_ref[...] = ctx


# ----------------------------------------------------------------------------
# One-time parameter prep: transpose nn.Linear weights, cast matmul operands to bf16.
# (Do this ONCE per model, not per decode step.)
# ----------------------------------------------------------------------------
def prepare_attention_params(params):
    return {
        "wphi_t": jnp.asarray(params["w_phi"].T, jnp.bfloat16),        # (D, H)
        "wpsi_t": jnp.asarray(params["w_psi"].T, jnp.bfloat16),        # (D, H)
        "bphi": jnp.asarray(params["b_phi"].reshape(1, -1), jnp.float32),
        "bpsi": jnp.asarray(params["b_psi"].reshape(1, -1), jnp.float32),
    }


# ----------------------------------------------------------------------------
# Wrapper: batch-first inputs, prepared parameters.
# ----------------------------------------------------------------------------
def attention_forward(decoder_state, listener_feat, prep, hidden_dim,
                      multi_head=1, block_b=None):
    """decoder_state: (B, 1, D), listener_feat: (B, T, D) -> ([score (B,T)], context (B,D))."""
    # TODO(synk): multi_head > 1 branch (per-head softmax + fc_reduce) not implemented;
    #             the reference PyTorch code for that branch is itself incomplete
    #             (torch.softmax missing dim argument).
    assert multi_head == 1, "only multi_head=1 is supported"

    B, Q, D = decoder_state.shape
    assert Q == 1
    _, T, D2 = listener_feat.shape
    assert D2 == D
    H = hidden_dim

    # Batch-block size: fill MXU rows (BB*T rows for the psi matmul) while keeping
    # >= 2 grid steps when B allows (so both v7x TensorCores get work).
    # TODO(synk): for a decode loop, hoist k = relu(psi(listener_feat)) out of the kernel
    #             and pass it in -- it is constant across decoder steps.
    if block_b is None:
        block_b = max(1, min(B, 8))
        if B > 1:
            block_b = min(block_b, max(1, B // 2))
    BB = block_b
    nblk = -(-B // BB)
    Bp = nblk * BB

    # bf16 matmul operands (f32 accumulation inside the kernel).
    dec = jnp.asarray(decoder_state, jnp.bfloat16)
    feat = jnp.asarray(listener_feat, jnp.bfloat16)
    if Bp != B:
        dec = jnp.pad(dec, ((0, Bp - B), (0, 0), (0, 0)))
        feat = jnp.pad(feat, ((0, Bp - B), (0, 0), (0, 0)))

    score, ctx = pl.pallas_call(
        _attention_kernel,
        out_shape=(jax.ShapeDtypeStruct((Bp, 1, T), jnp.float32),
                   jax.ShapeDtypeStruct((Bp, 1, D), jnp.float32)),
        grid_spec=pltpu.PrefetchScalarGridSpec(
            num_scalar_prefetch=0,
            grid=(nblk,),
            in_specs=[
                pl.BlockSpec((BB, 1, D), lambda b: (b, 0, 0)),    # decoder_state (bf16)
                pl.BlockSpec((BB, T, D), lambda b: (b, 0, 0)),    # listener_feat (bf16)
                pl.BlockSpec((D, H), lambda b: (0, 0)),           # W_phi^T (VMEM-resident)
                pl.BlockSpec((1, H), lambda b: (0, 0)),           # b_phi
                pl.BlockSpec((D, H), lambda b: (0, 0)),           # W_psi^T (VMEM-resident)
                pl.BlockSpec((1, H), lambda b: (0, 0)),           # b_psi
            ],
            out_specs=[
                pl.BlockSpec((BB, 1, T), lambda b: (b, 0, 0)),    # attention score
                pl.BlockSpec((BB, 1, D), lambda b: (b, 0, 0)),    # context
            ],
        ),
        compiler_params=pltpu.CompilerParams(
            dimension_semantics=("parallel",)),                   # batch blocks independent
    )(dec, feat, prep["wphi_t"], prep["bphi"], prep["wpsi_t"], prep["bpsi"])

    attention_score = [score[:B, 0, :]]          # list of (B, T), like the PyTorch module
    context = ctx[:B, 0, :]                      # (B, D)
    return attention_score, context


# ----------------------------------------------------------------------------
# Deterministic parameter init (shapes match nn.Linear: W (out, in), b (out,)).
# ----------------------------------------------------------------------------
def init_attention_params(key, input_dim, hidden_dim, multi_head=1):
    ks = jax.random.split(key, 4)
    u = lambda k, shape, fan_in: jax.random.uniform(
        k, shape, jnp.float32, -1.0 / jnp.sqrt(fan_in), 1.0 / jnp.sqrt(fan_in))
    return {
        "w_phi": u(ks[0], (hidden_dim * multi_head, input_dim), input_dim),
        "b_phi": u(ks[1], (hidden_dim * multi_head,), input_dim),
        "w_psi": u(ks[2], (hidden_dim, input_dim), input_dim),
        "b_psi": u(ks[3], (hidden_dim,), input_dim),
    }


# ----------------------------------------------------------------------------
# Pure-JAX f32 reference for correctness checking.
# ----------------------------------------------------------------------------
def _ref_attention(decoder_state, listener_feat, params):
    q = jax.nn.relu(decoder_state @ params["w_phi"].T + params["b_phi"])   # (B, 1, H)
    k = jax.nn.relu(listener_feat @ params["w_psi"].T + params["b_psi"])   # (B, T, H)
    energy = jnp.einsum("bqh,bth->bqt", q, k)[:, 0, :]                      # (B, T)
    score = jax.nn.softmax(energy, axis=-1)                                 # (B, T)
    context = jnp.einsum("bt,btd->bd", score, listener_feat)                # (B, D)
    return score, context


if __name__ == "__main__":
    B, T = 8, 16
    input_dim, hidden_dim = 32, 32

    key = jax.random.PRNGKey(0)
    k_dec, k_feat, k_par = jax.random.split(key, 3)
    decoder_state = jax.random.normal(k_dec, (B, 1, input_dim), jnp.float32)
    listener_feat = jax.random.normal(k_feat, (B, T, input_dim), jnp.float32)
    params = init_attention_params(k_par, input_dim, hidden_dim)
    prep = prepare_attention_params(params)       # one-time transpose + bf16 cast

    scores, context = attention_forward(decoder_state, listener_feat, prep,
                                        hidden_dim, block_b=4)   # grid = (2,)
    context = jax.block_until_ready(context)
    score0 = jax.block_until_ready(scores[0])

    # shape checks (match PyTorch AttentionLayer with multi_head=1)
    assert score0.shape == (B, T), score0.shape
    assert context.shape == (B, input_dim), context.shape

    # numerical check vs pure-JAX f32 reference (tolerances loosened for bf16 matmul
    # operands + approx EUP reciprocal inside the kernel)
    ref_score, ref_ctx = _ref_attention(decoder_state, listener_feat, params)
    assert jnp.allclose(score0, ref_score, rtol=5e-2, atol=1e-2), (
        float(jnp.max(jnp.abs(score0 - ref_score))))
    assert jnp.allclose(context, ref_ctx, rtol=5e-2, atol=5e-2), (
        float(jnp.max(jnp.abs(context - ref_ctx))))
    # softmax rows sum to ~1 (approx reciprocal)
    assert jnp.allclose(jnp.sum(score0, axis=-1), 1.0, atol=1e-2)

    print("KERNEL_OK")
</pallas_src>

<mosaic_0001>
module attributes {stable_mosaic.version = 11 : i64} {
  func.func @_attention_kernel(%arg0: i32, %arg1: memref<4x1x32xbf16, #tpu.memory_space<vmem>>, %arg2: memref<4x16x32xbf16, #tpu.memory_space<vmem>>, %arg3: memref<32x32xbf16, #tpu.memory_space<vmem>>, %arg4: memref<1x32xf32, #tpu.memory_space<vmem>>, %arg5: memref<32x32xbf16, #tpu.memory_space<vmem>>, %arg6: memref<1x32xf32, #tpu.memory_space<vmem>>, %arg7: memref<4x1x16xf32, #tpu.memory_space<vmem>>, %arg8: memref<4x1x32xf32, #tpu.memory_space<vmem>>) attributes {dimension_semantics = [#tpu.dimension_semantics<parallel>], iteration_bounds = array<i64: 2>, scalar_prefetch = 0 : i64, scratch_operands = 0 : i64, tpu.core_type = #tpu.core_type<tc>, window_params = [{transform_indices = @transform_0, window_bounds = array<i64: 4, 1, 32>}, {transform_indices = @transform_1, window_bounds = array<i64: 4, 16, 32>}, {pipeline_mode = #tpu.pipeline_mode<synchronous>, transform_indices = @transform_2, window_bounds = array<i64: 32, 32>}, {pipeline_mode = #tpu.pipeline_mode<synchronous>, transform_indices = @transform_3, window_bounds = array<i64: 1, 32>}, {pipeline_mode = #tpu.pipeline_mode<synchronous>, transform_indices = @transform_4, window_bounds = array<i64: 32, 32>}, {pipeline_mode = #tpu.pipeline_mode<synchronous>, transform_indices = @transform_5, window_bounds = array<i64: 1, 32>}, {transform_indices = @transform_6, window_bounds = array<i64: 4, 1, 16>}, {transform_indices = @transform_7, window_bounds = array<i64: 4, 1, 32>}]} {
    %c0 = arith.constant 0 : index
    %c0_0 = arith.constant 0 : index
    %c0_1 = arith.constant 0 : index
    %0 = vector.load %arg1[%c0, %c0_0, %c0_1] : memref<4x1x32xbf16, #tpu.memory_space<vmem>>, vector<4x1x32xbf16>
    %1 = vector.shape_cast %0 : vector<4x1x32xbf16> to vector<4x32xbf16>
    %c0_2 = arith.constant 0 : index
    %c0_3 = arith.constant 0 : index
    %c0_4 = arith.constant 0 : index
    %2 = vector.load %arg2[%c0_2, %c0_3, %c0_4] : memref<4x16x32xbf16, #tpu.memory_space<vmem>>, vector<4x16x32xbf16>
    %c0_5 = arith.constant 0 : index
    %c0_6 = arith.constant 0 : index
    %3 = vector.load %arg3[%c0_5, %c0_6] : memref<32x32xbf16, #tpu.memory_space<vmem>>, vector<32x32xbf16>
    %cst = arith.constant dense<0.000000e+00> : vector<4x32xf32>
    %4 = tpu.matmul %1, %3, %cst {dimension_numbers = #tpu.dot_dimension_numbers<[1], [0], [0], [1], [0, 0, 1, 1], [], []>} : vector<4x32xbf16>, vector<32x32xbf16>, vector<4x32xf32> -> vector<4x32xf32>
    %c0_7 = arith.constant 0 : index
    %c0_8 = arith.constant 0 : index
    %5 = vector.load %arg4[%c0_7, %c0_8] : memref<1x32xf32, #tpu.memory_space<vmem>>, vector<1x32xf32>
    %6 = vector.broadcast %5 : vector<1x32xf32> to vector<4x32xf32>
    %7 = arith.addf %4, %6 : vector<4x32xf32>
    %cst_9 = arith.constant 0.000000e+00 : f32
    %8 = vector.broadcast %cst_9 : f32 to vector<4x32xf32>
    %9 = arith.maximumf %7, %8 : vector<4x32xf32>
    %10 = vector.shape_cast %2 : vector<4x16x32xbf16> to vector<64x32xbf16>
    %c0_10 = arith.constant 0 : index
    %c0_11 = arith.constant 0 : index
    %11 = vector.load %arg5[%c0_10, %c0_11] : memref<32x32xbf16, #tpu.memory_space<vmem>>, vector<32x32xbf16>
    %cst_12 = arith.constant dense<0.000000e+00> : vector<64x32xf32>
    %12 = tpu.matmul %10, %11, %cst_12 {dimension_numbers = #tpu.dot_dimension_numbers<[1], [0], [0], [1], [0, 0, 1, 1], [], []>} : vector<64x32xbf16>, vector<32x32xbf16>, vector<64x32xf32> -> vector<64x32xf32>
    %c0_13 = arith.constant 0 : index
    %c0_14 = arith.constant 0 : index
    %13 = vector.load %arg6[%c0_13, %c0_14] : memref<1x32xf32, #tpu.memory_space<vmem>>, vector<1x32xf32>
    %14 = vector.broadcast %13 : vector<1x32xf32> to vector<64x32xf32>
    %15 = arith.addf %12, %14 : vector<64x32xf32>
    %cst_15 = arith.constant 0.000000e+00 : f32
    %16 = vector.broadcast %cst_15 : f32 to vector<64x32xf32>
    %17 = arith.maximumf %15, %16 : vector<64x32xf32>
    %18 = vector.shape_cast %17 : vector<64x32xf32> to vector<4x16x32xf32>
    %19 = vector.shape_cast %9 : vector<4x32xf32> to vector<4x1x32xf32>
    "tpu.trace_start"() <{level = 10 : i32, message = "bqh,bth->bqt"}> : () -> ()
    %cst_16 = arith.constant dense<0.000000e+00> : vector<4x1x16xf32>
    %20 = tpu.matmul %19, %18, %cst_16 {dimension_numbers = #tpu.dot_dimension_numbers<[2], [2], [1], [1], [0, 0, 0, 1, 1, 1], [0], [0]>} : vector<4x1x32xf32>, vector<4x16x32xf32>, vector<4x1x16xf32> -> vector<4x1x16xf32>
    "tpu.trace_stop"() : () -> ()
    %cst_17 = arith.constant dense<0xFF800000> : vector<4x1xf32>
    %21 = vector.multi_reduction <maximumf>, %20, %cst_17 [2] : vector<4x1x16xf32> to vector<4x1xf32>
    %22 = vector.shape_cast %21 : vector<4x1xf32> to vector<4x1x1xf32>
    %23 = vector.broadcast %22 : vector<4x1x1xf32> to vector<4x1x16xf32>
    %24 = arith.subf %20, %23 : vector<4x1x16xf32>
    %25 = math.exp %24 : vector<4x1x16xf32>
    %cst_18 = arith.constant dense<0.000000e+00> : vector<4x1xf32>
    %26 = vector.multi_reduction <add>, %25, %cst_18 [2] : vector<4x1x16xf32> to vector<4x1xf32>
    %27 = vector.shape_cast %26 : vector<4x1xf32> to vector<4x1x1xf32>
    %28 = tpu.reciprocal %27 {approx = true} : vector<4x1x1xf32> -> vector<4x1x1xf32>
    %29 = vector.broadcast %28 : vector<4x1x1xf32> to vector<4x1x16xf32>
    %30 = arith.mulf %25, %29 : vector<4x1x16xf32>
    %31 = arith.truncf %30 : vector<4x1x16xf32> to vector<4x1x16xbf16>
    "tpu.trace_start"() <{level = 10 : i32, message = "bqt,btd->bqd"}> : () -> ()
    %cst_19 = arith.constant dense<0.000000e+00> : vector<4x1x32xf32>
    %32 = tpu.matmul %31, %2, %cst_19 {dimension_numbers = #tpu.dot_dimension_numbers<[2], [1], [1], [2], [0, 0, 0, 1, 1, 2], [0], [0]>} : vector<4x1x16xbf16>, vector<4x16x32xbf16>, vector<4x1x32xf32> -> vector<4x1x32xf32>
    "tpu.trace_stop"() : () -> ()
    %c0_20 = arith.constant 0 : index
    %c0_21 = arith.constant 0 : index
    %c0_22 = arith.constant 0 : index
    %33 = vector.load %arg7[%c0_20, %c0_21, %c0_22] : memref<4x1x16xf32, #tpu.memory_space<vmem>>, vector<4x1x16xf32>
    tpu.vector_store %arg7[%c0_20, %c0_21, %c0_22], %30 {strides = array<i32>} : memref<4x1x16xf32, #tpu.memory_space<vmem>>, vector<4x1x16xf32>,
    %c0_23 = arith.constant 0 : index
    %c0_24 = arith.constant 0 : index
    %c0_25 = arith.constant 0 : index
    %34 = vector.load %arg8[%c0_23, %c0_24, %c0_25] : memref<4x1x32xf32, #tpu.memory_space<vmem>>, vector<4x1x32xf32>
    tpu.vector_store %arg8[%c0_23, %c0_24, %c0_25], %32 {strides = array<i32>} : memref<4x1x32xf32, #tpu.memory_space<vmem>>, vector<4x1x32xf32>,
    return
  }
  func.func @transform_0(%arg0: i32) -> (i32, i32, i32) {
    %c0_i32 = arith.constant 0 : i32
    %c0_i32_0 = arith.constant 0 : i32
    %c0_i32_1 = arith.constant 0 : i32
    return %arg0, %c0_i32, %c0_i32_0 : i32, i32, i32
  }
  func.func @transform_1(%arg0: i32) -> (i32, i32, i32) {
    %c0_i32 = arith.constant 0 : i32
    %c0_i32_0 = arith.constant 0 : i32
    %c0_i32_1 = arith.constant 0 : i32
    return %arg0, %c0_i32, %c0_i32_0 : i32, i32, i32
  }
  func.func @transform_2(%arg0: i32) -> (i32, i32) {
    %c0_i32 = arith.constant 0 : i32
    %c0_i32_0 = arith.constant 0 : i32
    %c0_i32_1 = arith.constant 0 : i32
    return %c0_i32, %c0_i32_0 : i32, i32
  }
  func.func @transform_3(%arg0: i32) -> (i32, i32) {
    %c0_i32 = arith.constant 0 : i32
    %c0_i32_0 = arith.constant 0 : i32
    %c0_i32_1 = arith.constant 0 : i32
    return %c0_i32, %c0_i32_0 : i32, i32
  }
  func.func @transform_4(%arg0: i32) -> (i32, i32) {
    %c0_i32 = arith.constant 0 : i32
    %c0_i32_0 = arith.constant 0 : i32
    %c0_i32_1 = arith.constant 0 : i32
    return %c0_i32, %c0_i32_0 : i32, i32
  }
  func.func @transform_5(%arg0: i32) -> (i32, i32) {
    %c0_i32 = arith.constant 0 : i32
    %c0_i32_0 = arith.constant 0 : i32
    %c0_i32_1 = arith.constant 0 : i32
    return %c0_i32, %c0_i32_0 : i32, i32
  }
  func.func @transform_6(%arg0: i32) -> (i32, i32, i32) {
    %c0_i32 = arith.constant 0 : i32
    %c0_i32_0 = arith.constant 0 : i32
    %c0_i32_1 = arith.constant 0 : i32
    return %arg0, %c0_i32, %c0_i32_0 : i32, i32, i32
  }
  func.func @transform_7(%arg0: i32) -> (i32, i32, i32) {
    %c0_i32 = arith.constant 0 : i32
    %c0_i32_0 = arith.constant 0 : i32
    %c0_i32_1 = arith.constant 0 : i32
    return %arg0, %c0_i32, %c0_i32_0 : i32, i32, i32
  }
}

</mosaic_0001>

<bundles_post_ra>
// kernel: tpu_custom_call.1
= control target key start
LH: loop header
LB: loop body
LE: loop exit
PB: predicated region body
PF: predicated region fallthrough
CT: control target
= control target key end

     0   :  { %13 = vsyncpa [#allocation3], 0  ;;  %s2213_s0 = inlined_call_operand.vmem [shape: bf16[8,1,32], index: 0, kind: input, shape index: {}]   ;;  %s2214_s1 = inlined_call_operand.hbm [shape: bf16[8,16,32], index: 1, kind: input, shape index: {}]   ;;  %s2215_s2 = inlined_call_operand.vmem [shape: bf16[32,32], index: 2, kind: input, shape index: {}]   ;;  %s2216_s3 = inlined_call_operand.vmem [shape: f32[1,32], index: 3, kind: input, shape index: {}]   ;;  %s2217_s4 = inlined_call_operand.hbm [shape: bf16[32,32], index: 4, kind: input, shape index: {}]   ;;  %s2218_s5 = inlined_call_operand.vmem [shape: f32[1,32], index: 5, kind: input, shape index: {}]   ;;  %s2219_s6 = inlined_call_operand.hbm [shape: f32[8,1,16], index: 6, kind: output, shape index: {0}]   ;;  %s2220_s7 = inlined_call_operand.hbm [shape: f32[8,1,32], index: 7, kind: output, shape index: {1}]  }
   0x1   :  { %15 = vsyncpa [#allocation3 + $0x1], 0 }
   0x2   :  { %16 = vsyncpa [#allocation6], 0 }
   0x3   :  { %17 = vsyncpa [#allocation4], 0 }
   0x4   :  { %19 = vsyncpa [#allocation4 + $0x1], 0 }
   0x5   :  { %20 = vsyncpa [#allocation9], 0 }
   0x6   :  { %22 = vsyncpa [#allocation9 + $0x1], 0  ;;  %s1846_s24 = smov 0   ;;  %s1848_s25 = smov 0  }
   0x7   :  { %s1850_s26 = smov 0   ;;  %s1852_s27 = smov 0  }
   0x8 LB: > { %s1867_s28 = sadd.s32 4294967295, %s1792_s27   ;;  %s1360_s29 = sadd.s32 4294967294, %s1792_s27   ;;  %s1792_s27 = sphi %s1852_s27, %s2244_s27   ;;  %s1788_s26 = sphi %s1850_s26, %s2243_s26   ;;  %s1784_s25 = sphi %s1848_s25, %s2242_s25   ;;  %s1780_s24 = sphi %s1846_s24, %s2241_s24  }
   0x9   : > { %p74_p0 = scmp.ne.s32.totalorder %s1784_s25, %s1780_s24  ;;  %p2221_p1 = scmp.eq.s32.totalorder %s1867_s28, 0 }
   0xa   : > { %p188_p3 = scmp.eq.s32.totalorder %s1360_s29, 1  ;;  %p1361_p5 = scmp.ge.s32.totalorder %s1792_s27, 1 }
   0xb   : > { %p1876_p4 = por %p2221_p1, %p74_p0  ;;  %p221_p7 = scmp.lt.s32.totalorder %s1792_s27, 3 }
   0xc   : > { %p1881_p6 = por %p188_p3, %p74_p0  ;;  %s1794_s10 = smov [#allocation5]  }
   0xd   : > { %s2225_s30 = scalar_select %p1876_p4, 1, 0 }
   0xe   : > { %s2226_s8 = scalar_select %p1881_p6, 1, 0 }
   0xf   : > { %p1886_p8 = pnand %p1361_p5, %p221_p7  ;;  %s239_s11 = sshll.u32 %s1794_s10, 4  ;;  %s1890_s11 = int_to_ptr.vmem [resolvable:$true] %s239_s11 }
  0x10   : > { %s1902_s13 = sadd.s32 1, %s1792_s27   ;;  %s61_s14 = sadd.s32 1, %s1788_s26 }
  0x11   : > { %s2227_s9 = scalar_select %p1886_p8, 1, 0 }
  0x12   : > { %p1548_p9 = pneg %p1886_p8  ;;  %s58_s15 = ssub.s32 %s1792_s27, %s1902_s13 }
  0x13   : > { %s1632_s18 = scalar_lea.hbm %s2217_s4, 256 }
  0x14   : > { %p1897_p11 = pnand %p1548_p9, %p2221_p1  ;;  %p1633_p12 = scmp.ne.s32.totalorder %s2217_s4, %s1632_s18 }
  0x15   : > { %p1639_p5 = scmp.lt.u32.totalorder %s1632_s18, %s2217_s4 }
  0x16   : > { %p1634_p13 = pneg %p1897_p11 }
  0x18   : > { %p1635_p0 = pnand %p1634_p13, %p1633_p12 }
  0x1a   : > { %p1636_p3 = pneg %p1635_p0 }
  0x1c   : > { %p1641_p7 = pnand %p1639_p5, %p1636_p3 }
  0x1e   : > { %1644 = shalt.err (!%p1641_p7)
}
  0x1f   : > { %s1645_s23 = scalar_lea.vmem %s1890_s11, 256  ;;  %p1653_p2 = scmp.lt.s32.totalorder %s1890_s11, %s1890_s11 }
  0x20   : > { %p1646_p9 = scmp.ne.s32.totalorder %s1890_s11, %s1645_s23  ;;  %p1654_p6 = scmp.lt.s32.totalorder %s1645_s23, %s1645_s23 }
  0x22   : > { %p1648_p10 = pnand %p1646_p9, %p1634_p13  ;;  %p1655_p4 = por %p1654_p6, %p1653_p2 }
  0x24   : > { %p1649_p1 = pneg %p1648_p10 }
  0x26   : > { %p1656_p8 = pnand %p1655_p4, %p1649_p1 }
  0x28   : > { %1659 = shalt.err (!%p1656_p8)
}
  0x29   : > { %s2224_s29 = smov 64   ;;  %s1796_s10 = smov 4  }
  0x2a   : > { %1551 = dma.hbm_to_vmem [thread:$0]  (!%p1897_p11), %s2217_s4, 256, %s1890_s11, [#allocation6], %s2224_s29, %s2224_s29, %s1796_s10  }
  0x2b   : > { %p59_p1 = scmp.eq.s32.totalorder %s58_s15, 0  ;;  %p68_p2 = scmp.ne.s32.totalorder %s1788_s26, %s1784_s25 }
  0x2c   : > { %p69_p4 = scmp.eq.s32.totalorder %s1792_s27, 0  ;;  %p1564_p6 = scmp.lt.s32.totalorder %s1792_s27, 2 }
  0x2d   : > { %s1936_s18 = scalar_select %p59_p1, %s1788_s26, %s61_s14  }
  0x2e   : > { %p70_p8 = por %p69_p4, %p68_p2  ;;  %p2229_p10 = scmp.eq.s32.totalorder %s1867_s28, 1 }
  0x2f   : > { %s264_s12 = sand.u32 1, %s1788_s26   ;;  %s1418_s20 = sshll.u32 %s1792_s27, 9 }
  0x30   : > { %p1940_p12 = por %p2229_p10, %p68_p2  ;;  %s1364_s21 = sshll.u32 %s264_s12, 5 }
  0x31   : > { %s1949_s16 = scalar_lea.hbm %s2214_s1, %s1418_s20  ;;  %s268_s11 = scalar_lea.vmem [#allocation2], %s1364_s21 }
  0x32   : > { %s276_s14 = sshll.u32 %s268_s11, 4  ;;  %p1951_p11 = pnand %p1564_p6, %p70_p8  ;;  %s1955_s14 = int_to_ptr.vmem [resolvable:$true] %s276_s14 }
  0x33   : > { %s1957_s17 = scalar_lea.sflag [#allocation3], %s264_s12  ;;  %s1660_s29 = scalar_lea.hbm %s1949_s16, 512 }
  0x34   : > { %p1661_p13 = scmp.ne.s32.totalorder %s1949_s16, %s1660_s29  ;;  %p1662_p0 = pneg %p1951_p11 }
  0x35   : > { %s1665_s22 = scalar_lea.hbm %s2214_s1, 1024  ;;  %p1666_p7 = scmp.lt.u32.totalorder %s1949_s16, %s2214_s1 }
  0x36   : > { %p1663_p3 = pnand %p1662_p0, %p1661_p13  ;;  %p1667_p9 = scmp.lt.u32.totalorder %s1665_s22, %s1660_s29 }
  0x37   : > { %p1669_p2 = scmp.lt.u32.totalorder %s1660_s29, %s1949_s16 }
  0x38   : > { %p1664_p5 = pneg %p1663_p3  ;;  %p1668_p1 = por %p1667_p9, %p1666_p7 }
  0x3a   : > { %p1670_p4 = por %p1669_p2, %p1668_p1 }
  0x3c   : > { %p1671_p6 = pnand %p1670_p4, %p1664_p5 }
  0x3e   : > { %1674 = shalt.err (!%p1671_p6)
}
  0x3f   : > { %s1675_s12 = scalar_lea.vmem %s1955_s14, 512  ;;  %s1797_s20 = smov [#allocation2]  }
  0x40   : > { %p1676_p8 = scmp.ne.s32.totalorder %s1955_s14, %s1675_s12  ;;  %s1680_s21 = sshll.u32 %s1797_s20, 4  ;;  %s1681_s21 = int_to_ptr.vmem [resolvable:$false] %s1680_s21 }
  0x41   : > { %s1682_s23 = scalar_lea.vmem %s1681_s21, 1024  ;;  %p1683_p3 = scmp.lt.s32.totalorder %s1955_s14, %s1681_s21 }
  0x42   : > { %p1678_p10 = pnand %p1676_p8, %p1662_p0  ;;  %p1684_p7 = scmp.lt.s32.totalorder %s1682_s23, %s1675_s12 }
  0x44   : > { %p1679_p13 = pneg %p1678_p10  ;;  %p1685_p9 = por %p1684_p7, %p1683_p3 }
  0x46   : > { %p1686_p1 = pnand %p1685_p9, %p1679_p13 }
  0x48   : > { %1689 = shalt.err (!%p1686_p1)
}
  0x49   : > { %s2232_s29 = smov 64   ;;  %p2233_p0 = scmp.ne.s32.totalorder %s2227_s9, 0 }
  0x4a   : > { %1555 = dma.hbm_to_vmem [thread:$0]  (!%p1951_p11), %s1949_s16, 512, %s1955_s14, %s1957_s17, %s2232_s29, %s2232_s29, %s1796_s10  }
  0x4b   : > { %288 = sbr.rel (%p2233_p0) target bundleno = 1096 (0x448), region = 44  ;;  %s1991_s22 = sand.u32 (!%p2233_p0), 1, %s1784_s25  }
  0x4c   : > { %s1369_s11 = sshll.u32 (!%p2233_p0), %s1991_s22, 5  ;;  %s291_s12 = scalar_lea.sflag (!%p2233_p0), [#allocation3], %s1991_s22 }
  0x4d   : > { %s1995_s20 = scalar_lea.vmem (!%p2233_p0), [#allocation2], %s1369_s11  ;;  %p2234_p5 = scmp.ne.s32.totalorder (!%p2233_p0), %s2225_s30, 0 }
  0x52   : > { %1763 = dma.done.wait (%p2234_p5), %s291_s12, 512  }
  0x53   : > { %1765 = vsyncadd (%p2234_p5), %s291_s12, 4294966784  ;;  %p2235_p11 = scmp.eq.s32.totalorder %s1867_s28, 0 }
  0x55   : > { %1767 = dma.done.wait (%p2235_p11), [#allocation6], 256   ;;  %p2236_p2 = pmov %p2235_p11 }
  0x56   : > { %v1798_v0 = vmov 0.0   ;;  %vm1799_vm0 = vmmov 0   ;;  %s1373_s9 = sshll.u32 %s1867_s28, 2  ;;  %v384_v1 = vlaneseq  ;;  %v1800_v2 = vmov 1966171168   ;;  %v1608_v4 = vld [vmem:[#allocation5] sm:$0xff]  }
  0x57   : > { %1769 = vsyncadd (%p2236_p2), [#allocation6], 4294967040  ;;  %1450 = vmatprep.subr.bf16.mxu0 %v1798_v0  ;;  %1454 = vmatprep.mubr.msk.bf16.mxu0 %vm1799_vm0, %v1798_v0  ;;  %p339_p4 = scmp.lt.s32.totalorder %s1373_s9, 7  ;;  %v382_v3 = vunpack.c.l.s4 %v1800_v2  ;;  %vm456_vm1 = vcmask 261120   ;;  %v1609_v6 = vld [vmem:[#allocation5 + $0x8] sm:$0xff]   ;;  %v2010_v8 = vld [vmem:[%s1995_s20] sm:$0xff]  }
  0x58   : > { %v385_v5 = vshrl.u32 %v384_v1, 7  ;;  %1458 = vmatprep.subr.bf16.mxu1 %v1608_v4  ;;  %1462 = vmatprep.mubr.msk.bf16.mxu1 %vm456_vm1, %v2010_v8  ;;  %v2015_v9 = vld [vmem:[%s1995_s20 + $0x8] sm:$0xff]   ;;  %v1612_v10 = vld [vmem:[%s2215_s2] sm:$0xff]   ;;  %v1613_v11 = vld [vmem:[%s2215_s2 + $0x8] sm:$0xff]   ;;  %vm435_vm2 = vcmask 1041409   ;;  %vm438_vm3 = vcmask 1042434  }
  0x59   : > { %s2246_s9 = smov (!%p339_p4, %s1373_s9), 7  ;;  %v383_v7 = vunpack.c.0.s8 %v382_v3  ;;  %1459 = vmatpush3.bf16.msra.mxu1 %v1608_v4  ;;  %1451 = vmatpush3.bf16.msra.mxu0 %v1612_v10  ;;  %v2029_v13 = vld [vmem:[%s1995_s20 + $0x10] sm:$0xff]   ;;  %vm441_vm4 = vcmask 1043459   ;;  %v2041_v28 = vld [vmem:[%s1995_s20 + $0x18] sm:$0xff]   ;;  %v1801_v34 = vmov 0.0|0.0   ;;  %vm2055_vm5 = vmpackc.low %vm456_vm1, %vm456_vm1  ;;  %vm966_vm6 = vcmask 122880  }
  0x5a   : > { %1460 = vmatprep.subr.bf16.mxu1 %v1609_v6  ;;  %s341_s21 = scalar_lea.vmem %s2213_s0, %s2246_s9  ;;  %1452 = vmatprep.subr.bf16.mxu0 %v1798_v0  ;;  %v1382_v35 = vld [vmem:[%s2218_s5] ss:$0 sm:$0xff]  ;;  %s1371_s20 = sshll.u32 %s1991_s22, 2  ;;  %vm1016_vm7 = vcmask 130048  }
  0x5b   : > { %v2026_v12 = vsub.s32 %v383_v7, %v385_v5  ;;  %v1375_v14 = vld.sshfl [vmem:[%s341_s21] sm:$0x1 pattern:$0x75316420]  ;;  %s330_s9 = scalar_lea.vmem [#allocation7], %s1371_s20  ;;  %s1419_s10 = sshll.u32 %s1867_s28, 6 }
  0x5c   : > { %v1376_v15 = vld.sshfl [vmem:[%s341_s21 + $0x1] sm:$0x1 pattern:$0x75316420]  ;;  %v1374_v51 = vld [vmem:[%s2216_s3] ss:$0 sm:$0xff]  ;;  %s2124_s15 = scalar_lea.hbm %s2219_s6, %s1419_s10 }
  0x5d   : > { %1461 = vmatpush3.bf16.msra.mxu1 %v1609_v6  ;;  %v387_v16 = vrot.slane %v1375_v14, %v2026_v12  ;;  %v1377_v17 = vld.sshfl [vmem:[%s341_s21 + $0x2] sm:$0x1 pattern:$0x75316420]  ;;  %v401_v18 = vrot.slane %v1376_v15, %v2026_v12  ;;  %1453 = vmatpush3.bf16.msra.mxu0 %v1613_v11  ;;  %s1220_s30 = sshll.u32 %s330_s9, 4  ;;  %s1202_s17 = scalar_lea.sflag [#allocation4], %s1991_s22  ;;  %s2116_s30 = int_to_ptr.vmem [resolvable:$true] %s1220_s30 }
  0x5e   : > { %v1378_v19 = vld.sshfl [vmem:[%s341_s21 + $0x3] sm:$0x1 pattern:$0x75316420]  ;;  %v415_v20 = vrot.slane %v1377_v17, %v2026_v12  ;;  %1522 = vmatprep.subr.bf16.mxu0 %v1801_v34  ;;  %1530 = vmatprep.subr.bf16.mxu1 %v1801_v34  ;;  %s1690_s21 = scalar_lea.vmem %s2116_s30, 64  ;;  %s1802_s23 = smov [#allocation7]  }
  0x5f   : > { %v429_v21 = vrot.slane %v1378_v19, %v2026_v12  ;;  %v430_v22 = vunpack.c.l.b16 %v387_v16  ;;  %v431_v23 = vunpack.c.l.b16 %v401_v18  ;;  %p1691_p6 = scmp.ne.s32.totalorder %s2116_s30, %s1690_s21  ;;  %s1694_s29 = sshll.u32 %s1802_s23, 4  ;;  %s1695_s29 = int_to_ptr.vmem [resolvable:$false] %s1694_s29 }
  0x60   : > { %1463 = vmatmul.mubr.msk.bf16.vlgmr.msra.gmra.mrb[0].mxu1 %vm456_vm1, %v2015_v9  ;;  %v432_v24 = vunpack.c.l.b16 %v415_v20  ;;  %s1696_s11 = scalar_lea.vmem %s1695_s29, 128  ;;  %p1697_p13 = scmp.lt.s32.totalorder %s2116_s30, %s1695_s29 }
  0x61   : > { %1466 = vmatprep.mubr.msk.bf16.mxu1 %vm456_vm1, %v2029_v13  ;;  %v433_v25 = vunpack.c.l.b16 %v429_v21  ;;  %v434_v26 = vrot.slane %v431_v23, 7  ;;  %p1692_p8 = pnand %p1691_p6, %p1940_p12  ;;  %p1698_p3 = scmp.lt.s32.totalorder %s1696_s11, %s1690_s21 }
  0x62   : > { %v437_v27 = vrot.slane %v432_v24, 6 }
  0x63   : > { %v436_v29 = vsel %vm435_vm2, %v434_v26, %v430_v22  ;;  %v440_v30 = vrot.slane %v433_v25, 5  ;;  %p1693_p10 = pneg %p1692_p8  ;;  %p1699_p7 = por %p1698_p3, %p1697_p13 }
  0x64   : > { %v439_v31 = vsel %vm438_vm3, %v437_v27, %v436_v29 }
  0x65   : > { %v442_v32 = vsel %vm441_vm4, %v440_v30, %v439_v31  ;;  %p1700_p9 = pnand %p1699_p7, %p1693_p10 }
  0x66   : > { %v443_v33 = vpack.c.b16 %v442_v32, %v442_v32 }
  0x68   : > { %1467 = vmatmul.mubr.msk.bf16.gmra.mrb[4].mxu1 %vm456_vm1, %v2041_v28  ;;  %1455 = vmatmul.mubr.msk.bf16.vlgmr.msra.gmra.mrb[0].mxu0 %vm456_vm1, %v443_v33 }
  0x69   : > { %1488 = vmatprep.mubr.msk.f32.mxu1 %vm1799_vm0, %v1798_v0  ;;  %1474 = vmatprep.mubr.msk.f32.mxu0 %vm1799_vm0, %v1798_v0 }
 0x133   : > { %v1464_v36 = vpop.f32.mrb[0].mxu1 }
 0x134   : > { %v599_v37 = vadd.f32 %v1464_v36, %v1382_v35  ;;  %v590_v38 = vpop.f32.mrb[1].mxu1 }
 0x135   : > { %v591_v39 = vadd.f32 %v1382_v35, %v590_v38  ;;  %v1465_v40 = vpop.f32.mrb[2].mxu1 }
 0x136   : > { %v602_v41 = vadd.f32 %v1465_v40, %v1382_v35  ;;  %v593_v42 = vpop.f32.mrb[3].mxu1  ;;  %v623_v44 = vmax.f32 %v599_v37, 0.0 }
 0x137   : > { %v594_v43 = vadd.f32 %v1382_v35, %v593_v42  ;;  %v621_v46 = vmax.f32 %v591_v39, 0.0 }
 0x138   : > { %v624_v45 = vmax.f32 %v602_v41, 0.0 }
 0x139   : > { %v622_v47 = vmax.f32 %v594_v43, 0.0 }
 0x13a   : > { %v1527_v48 = vpack.c.bf16 %v624_v45, %v623_v44 }
 0x13b   : > { %v1523_v50 = vpack.c.bf16 %v622_v47, %v621_v46  ;;  %v1468_v52 = vpop.f32.mrb[4].mxu1  ;;  %v494_v55 = vpop.f32.mrb[0].mxu0 }
 0x13c   : > { %v615_v53 = vadd.f32 %v1468_v52, %v1382_v35  ;;  %v606_v54 = vpop.f32.mrb[5].mxu1  ;;  %v495_v58 = vadd.f32 %v1374_v51, %v494_v55  ;;  %v1456_v62 = vpop.f32.mrb[1].mxu0 }
 0x13d   : > { %v607_v56 = vadd.f32 %v1382_v35, %v606_v54  ;;  %v1469_v57 = vpop.f32.mrb[6].mxu1  ;;  %1525 = vmatpush3.bf16.xpose.msk.msra.mxu0 %vm2055_vm5, %v1523_v50  ;;  %v497_v2 = vpop.f32.mrb[2].mxu0 }
 0x13e   : > { %v627_v59 = vmax.f32 %v615_v53, 0.0  ;;  %v618_v60 = vadd.f32 %v1469_v57, %v1382_v35  ;;  %v609_v61 = vpop.f32.mrb[7].mxu1  ;;  %1526 = vmatprep.subr.bf16.mxu0 %v1801_v34  ;;  %v500_v3 = vmax.f32 %v495_v58, 0.0  ;;  %v1457_v5 = vpop.f32.mrb[3].mxu0 }
 0x13f   : > { %v625_v63 = vmax.f32 %v607_v56, 0.0  ;;  %v610_v1 = vadd.f32 %v1382_v35, %v609_v61 }
 0x140   : > { %v628_v4 = vmax.f32 %v618_v60, 0.0  ;;  %v636_v7 = vrot.slane %v500_v3, %v2026_v12 }
 0x141   : > { %v626_v6 = vmax.f32 %v610_v1, 0.0 }
 0x142   : > { %v1535_v10 = vpack.c.bf16 %v628_v4, %v627_v59  ;;  %v644_v14 = vrot.slane %v636_v7, %v2026_v12  ;;  %v637_v15 = vcombine.high %v636_v7, %v636_v7 }
 0x143   : > { %v1531_v11 = vpack.c.bf16 %v626_v6, %v625_v63 }
 0x144   : > { %1475 = vmatmul.mubr.msk.f32.vlgmr.msra.gmra.mrb[4].mxu0 %vm456_vm1, %v644_v14  ;;  %v652_v16 = vcombine.high %v644_v14, %v644_v14  ;;  %v651_v17 = vrot.slane %v637_v15, %v2026_v12 }
 0x145   : > { %1533 = vmatpush3.bf16.xpose.msk.msra.mxu1 %vm2055_vm5, %v1531_v11  ;;  %1529 = vmatpush3.bf16.xpose.msk.msra.mxu0 %vm2055_vm5, %v1527_v48 }
 0x146   : > { %1498 = vmatprep.subr.bf16.mxu1 %v1798_v0  ;;  %1481 = vmatprep.mubr.msk.f32.mxu0 %vm1799_vm0, %v1798_v0  ;;  %v653_v12 = vcombine.high %v651_v17, %v651_v17 }
 0x147   : > { %1534 = vmatprep.subr.bf16.mxu0 %v1801_v34 }
 0x14c   : > { %1489 = vmatmul.mubr.msk.f32.vlgmr.msra.gmra.mrb[8].mxu1 %vm456_vm1, %v652_v16  ;;  %1482 = vmatmul.mubr.msk.f32.vlgmr.msra.gmra.mrb[6].mxu0 %vm456_vm1, %v651_v17 }
 0x14d   : > { %1499 = vmatpush3.bf16.msra.mxu1 %v2010_v8  ;;  %1500 = vmatprep.mubr.msk.bf16.mxu1 %vm1799_vm0, %v1798_v0 }
 0x14e   : > { %1510 = vmatprep.subr.bf16.mxu1 %v1798_v0  ;;  %1537 = vmatpush3.bf16.xpose.msk.msra.mxu0 %vm2055_vm5, %v1535_v10 }
 0x14f   : > { %1495 = vmatprep.mubr.msk.f32.mxu0 %vm1799_vm0, %v1798_v0  ;;  %1504 = vmatprep.subr.bf16.mxu0 %v1798_v0 }
 0x155   : > { %1496 = vmatmul.mubr.msk.f32.vlgmr.msra.gmra.mrb[8].mxu0 %vm456_vm1, %v653_v12 }
 0x156   : > { %1505 = vmatpush3.bf16.msra.mxu0 %v2015_v9  ;;  %1506 = vmatprep.mubr.msk.bf16.mxu0 %vm1799_vm0, %v1798_v0 }
 0x157   : > { %1516 = vmatprep.subr.bf16.mxu0 %v1798_v0 }
 0x217   : > { %v728_v8 = vpop.f32.mrb[4].mxu0 }
 0x218   : > { %v967_v18 = vsel %vm966_vm6, %v728_v8, -inf  ;;  %v1476_v19 = vpop.f32.mrb[5].mxu0 }
 0x219   : > { %968 = vmax.xlane.f32.xlu0 %v967_v18 }
 0x21f   : > { %v884_v20 = vpop.f32.mrb[8].mxu1  ;;  %v806_v23 = vpop.f32.mrb[6].mxu0 }
 0x220   : > { %v1490_v21 = vpop.f32.mrb[9].mxu1  ;;  %v973_v22 = vsel %vm966_vm6, %v884_v20, -inf  ;;  %v1483_v24 = vpop.f32.mrb[7].mxu0  ;;  %v970_v9 = vsel %vm966_vm6, %v806_v23, -inf }
 0x221   : > { %974 = vmax.xlane.f32.xlu1 %v973_v22  ;;  %971 = vmax.xlane.f32.xlu0 %v970_v9 }
 0x228   : > { %v962_v25 = vpop.f32.mrb[8].mxu0 }
 0x229   : > { %v1497_v26 = vpop.f32.mrb[9].mxu0  ;;  %v976_v27 = vsel %vm966_vm6, %v962_v25, -inf }
 0x22a   : > { %977 = vmax.xlane.f32.xlu1 %v976_v27 }
 0x2a6   : > { %v969_v29 = vpop.xlane.xlu0 %968 }
 0x2a7   : > { %v979_v30 = vsub.f32 %v728_v8, %v969_v29 }
 0x2a9   : > { %v983_v31 = vmul.f32 1.442695, %v979_v30 }
 0x2ab   : > { %1616 = vpow2.f32 %v983_v31 }
 0x2ae   : > { %v975_v32 = vpop.xlane.xlu1 %974  ;;  %v972_v34 = vpop.xlane.xlu0 %971 }
 0x2af   : > { %v981_v33 = vsub.f32 %v884_v20, %v975_v32  ;;  %v980_v36 = vsub.f32 %v806_v23, %v972_v34 }
 0x2b1   : > { %v987_v35 = vmul.f32 1.442695, %v981_v33  ;;  %v985_v37 = vmul.f32 1.442695, %v980_v36 }
 0x2b3   : > { %1618 = vpow2.f32 %v987_v35 }
 0x2b4   : > { %1620 = vpow2.f32 %v985_v37 }
 0x2b5   : > { %v1617_v38 = vpop.eup %1616 }
 0x2b6   : > { %v991_v40 = vsel %vm966_vm6, %v1617_v38, 0.0 }
 0x2b7   : > { %v978_v39 = vpop.xlane.xlu1 %977  ;;  %992 = vadd.xlane.f32.xlu0 %v991_v40 }
 0x2b8   : > { %v982_v41 = vsub.f32 %v962_v25, %v978_v39 }
 0x2ba   : > { %v989_v42 = vmul.f32 1.442695, %v982_v41 }
 0x2bc   : > { %1622 = vpow2.f32 %v989_v42 }
 0x2bd   : > { %v1619_v43 = vpop.eup %1618 }
 0x2be   : > { %v997_v44 = vsel %vm966_vm6, %v1619_v43, 0.0  ;;  %v1621_v45 = vpop.eup %1620 }
 0x2bf   : > { %998 = vadd.xlane.f32.xlu0 %v997_v44  ;;  %v994_v46 = vsel %vm966_vm6, %v1621_v45, 0.0 }
 0x2c0   : > { %995 = vadd.xlane.f32.xlu1 %v994_v46 }
 0x2c6   : > { %v1623_v47 = vpop.eup %1622 }
 0x2c7   : > { %v1000_v48 = vsel %vm966_vm6, %v1623_v47, 0.0 }
 0x2c8   : > { %1001 = vadd.xlane.f32.xlu1 %v1000_v48 }
 0x344   : > { %v993_v49 = vpop.xlane.xlu0 %992 }
 0x345   : > { %1624 = vrcp.f32 %v993_v49 }
 0x34c   : > { %v999_v50 = vpop.xlane.xlu0 %998 }
 0x34d   : > { %1626 = vrcp.f32 %v999_v50  ;;  %v996_v51 = vpop.xlane.xlu1 %995 }
 0x34e   : > { %1628 = vrcp.f32 %v996_v51 }
 0x34f   : > { %v1625_v52 = vpop.eup %1624 }
 0x350   : > { %v1007_v53 = vmul.f32 %v1625_v52, %v1617_v38 }
 0x352   : > { %v1011_v54 = vpack.c.bf16 %v1007_v53, %v1007_v53  ;;  %1192 = vst.msk [vmem:[%s330_s9] sm:$0x1] %vm966_vm6, %v1007_v53 }
 0x354   : > { %1501 = vmatmul.mubr.msk.bf16.vlgmr.msra.gmra.mrb[12].mxu1 %vm1016_vm7, %v1011_v54 }
 0x355   : > { %v1002_v55 = vpop.xlane.xlu1 %1001  ;;  %1511 = vmatpush3.bf16.msra.mxu1 %v2029_v13  ;;  %1512 = vmatprep.mubr.msk.bf16.mxu1 %vm1799_vm0, %v1798_v0 }
 0x356   : > { %1630 = vrcp.f32 %v1002_v55 }
 0x357   : > { %v1627_v56 = vpop.eup %1626 }
 0x358   : > { %v1009_v57 = vmul.f32 %v1627_v56, %v1619_v43  ;;  %v1629_v58 = vpop.eup %1628 }
 0x359   : > { %v1008_v59 = vmul.f32 %v1629_v58, %v1621_v45 }
 0x35a   : > { %v1013_v60 = vpack.c.bf16 %v1009_v57, %v1009_v57  ;;  %1194 = vst.msk [vmem:[%s330_s9 + $0x2] sm:$0x1] %vm966_vm6, %v1009_v57 }
 0x35b   : > { %v1012_v61 = vpack.c.bf16 %v1008_v59, %v1008_v59  ;;  %1193 = vst.msk [vmem:[%s330_s9 + $0x1] sm:$0x1] %vm966_vm6, %v1008_v59 }
 0x35c   : > { %1513 = vmatmul.mubr.msk.bf16.vlgmr.msra.gmra.mrb[16].mxu1 %vm1016_vm7, %v1013_v60 }
 0x35d   : > { %1507 = vmatmul.mubr.msk.bf16.vlgmr.msra.gmra.mrb[12].mxu0 %vm1016_vm7, %v1012_v61 }
 0x35e   : > { %1517 = vmatpush3.bf16.msra.mxu0 %v2041_v28  ;;  %1518 = vmatprep.mubr.msk.bf16.mxu0 %vm1799_vm0, %v1798_v0 }
 0x360   : > { %v1631_v13 = vpop.eup %1630 }
 0x361   : > { %v1010_v62 = vmul.f32 %v1631_v13, %v1623_v47 }
 0x363   : > { %v1014_v63 = vpack.c.bf16 %v1010_v62, %v1010_v62  ;;  %1195 = vst.msk [vmem:[%s330_s9 + $0x3] sm:$0x1] %vm966_vm6, %v1010_v62 }
 0x365   : > { %1519 = vmatmul.mubr.msk.bf16.vlgmr.msra.gmra.mrb[16].mxu0 %vm1016_vm7, %v1014_v63 }
 0x366   : > { %1703 = shalt.err (!%p1700_p9)
}
 0x367   : > { %s1704_s12 = scalar_lea.hbm %s2124_s15, 64  ;;  %s1708_s14 = scalar_lea.hbm %s2219_s6, 128 }
 0x368   : > { %p1705_p1 = scmp.ne.s32.totalorder %s2124_s15, %s1704_s12  ;;  %p1709_p11 = scmp.lt.u32.totalorder %s2124_s15, %s2219_s6 }
 0x369   : > { %p1710_p2 = scmp.lt.u32.totalorder %s1708_s14, %s1704_s12  ;;  %p1712_p6 = scmp.lt.u32.totalorder %s1704_s12, %s2124_s15 }
 0x36a   : > { %p1706_p0 = pnand %p1705_p1, %p1940_p12 }
 0x36b   : > { %p1711_p4 = por %p1710_p2, %p1709_p11 }
 0x36c   : > { %p1707_p5 = pneg %p1706_p0 }
 0x36d   : > { %p1713_p8 = por %p1712_p6, %p1711_p4 }
 0x36f   : > { %p1714_p10 = pnand %p1713_p8, %p1707_p5 }
 0x371   : > { %1717 = shalt.err (!%p1714_p10)
}
 0x372   : > { %s1803_s21 = smov 16   ;;  %s1804_s11 = smov 1   ;;  %vm1196_vm8 = vcmask 253952  }
 0x373   : > { %1544 = dma.vmem_to_hbm [thread:$0]  (%p1940_p12), %s2116_s30, 64, %s2124_s15, %s1202_s17, %s1803_s21, %s1803_s21, %s1804_s11  }
 0x374   : > { %s337_s12 = scalar_lea.vmem [#allocation8], %s1371_s20  ;;  %s2165_s17 = scalar_lea.hbm %s2220_s7, %s1419_s10 }
 0x375   : > { %s1236_s30 = sshll.u32 %s337_s12, 4  ;;  %s1207_s9 = scalar_lea.sflag [#allocation9], %s1991_s22  ;;  %s2158_s30 = int_to_ptr.vmem [resolvable:$true] %s1236_s30 }
 0x376   : > { %s1718_s16 = scalar_lea.vmem %s2158_s30, 64  ;;  %s1805_s28 = smov [#allocation8]  }
 0x377   : > { %p1719_p13 = scmp.ne.s32.totalorder %s2158_s30, %s1718_s16  ;;  %s1722_s14 = sshll.u32 %s1805_s28, 4  ;;  %s1723_s14 = int_to_ptr.vmem [resolvable:$false] %s1722_s14 }
 0x378   : > { %s1724_s23 = scalar_lea.vmem %s1723_s14, 128  ;;  %p1725_p9 = scmp.lt.s32.totalorder %s2158_s30, %s1723_s14 }
 0x379   : > { %p1720_p3 = pnand %p1719_p13, %p1940_p12  ;;  %p1726_p1 = scmp.lt.s32.totalorder %s1724_s23, %s1718_s16 }
 0x37b   : > { %p1721_p7 = pneg %p1720_p3  ;;  %p1727_p0 = por %p1726_p1, %p1725_p9 }
 0x37d   : > { %p1728_p5 = pnand %p1727_p0, %p1721_p7 }
 0x427   : > { %v1054_v0 = vpop.f32.mrb[12].mxu1 }
 0x428   : > { %1197 = vst.msk [vmem:[%s337_s12] sm:$0x1] %vm1196_vm8, %v1054_v0  ;;  %v1502_v28 = vpop.f32.mrb[13].mxu1 }
 0x429   : > { %v1057_v1 = vpop.f32.mrb[14].mxu1 }
 0x42a   : > { %v1503_v2 = vpop.f32.mrb[15].mxu1 }
 0x42f   : > { %v1142_v4 = vpop.f32.mrb[16].mxu1 }
 0x430   : > { %v1098_v3 = vpop.f32.mrb[12].mxu0  ;;  %1199 = vst.msk [vmem:[%s337_s12 + $0x2] sm:$0x1] %vm1196_vm8, %v1142_v4  ;;  %v1514_v6 = vpop.f32.mrb[17].mxu1 }
 0x431   : > { %1198 = vst.msk [vmem:[%s337_s12 + $0x1] sm:$0x1] %vm1196_vm8, %v1098_v3  ;;  %v1508_v5 = vpop.f32.mrb[13].mxu0  ;;  %v1145_v10 = vpop.f32.mrb[18].mxu1 }
 0x432   : > { %v1101_v7 = vpop.f32.mrb[14].mxu0  ;;  %v1515_v14 = vpop.f32.mrb[19].mxu1 }
 0x433   : > { %v1509_v11 = vpop.f32.mrb[15].mxu0 }
 0x438   : > { %v1186_v15 = vpop.f32.mrb[16].mxu0 }
 0x439   : > { %1200 = vst.msk [vmem:[%s337_s12 + $0x3] sm:$0x1] %vm1196_vm8, %v1186_v15  ;;  %v1520_v16 = vpop.f32.mrb[17].mxu0 }
 0x43a   : > { %v1189_v17 = vpop.f32.mrb[18].mxu0 }
 0x43b   : > { %1731 = shalt.err (!%p1728_p5)
}
 0x43c   : > { %s1732_s10 = scalar_lea.hbm %s2165_s17, 64  ;;  %s1736_s20 = scalar_lea.hbm %s2220_s7, 128 }
 0x43d   : > { %p1733_p11 = scmp.ne.s32.totalorder %s2165_s17, %s1732_s10  ;;  %p1737_p6 = scmp.lt.u32.totalorder %s2165_s17, %s2220_s7 }
 0x43e   : > { %p1738_p8 = scmp.lt.u32.totalorder %s1736_s20, %s1732_s10  ;;  %p1740_p13 = scmp.lt.u32.totalorder %s1732_s10, %s2165_s17 }
 0x43f   : > { %p1734_p2 = pnand %p1733_p11, %p1940_p12 }
 0x440   : > { %p1739_p10 = por %p1738_p8, %p1737_p6 }
 0x441   : > { %p1735_p4 = pneg %p1734_p2 }
 0x442   : > { %p1741_p3 = por %p1740_p13, %p1739_p10 }
 0x444   : > { %p1742_p7 = pnand %p1741_p3, %p1735_p4 }
 0x446   : > { %1745 = shalt.err (!%p1742_p7)
}
 0x447   : > { %1545 = dma.vmem_to_hbm [thread:$0]  (%p1940_p12), %s2158_s30, 64, %s2165_s17, %s1207_s9, %s1803_s21, %s1803_s21, %s1804_s11   ;;  %v1521_v12 = vpop.f32.mrb[19].mxu0 }
 0x448 PF: > { %s1251_s16 = sand.u32 1, %s1780_s24   ;;  %p2239_p9 = scmp.ne.s32.totalorder %s2226_s8, 0 }
 0x449   : > { %p2240_p1 = scmp.ge.s32.totalorder %s1792_s27, 2  ;;  %s1252_s14 = scalar_lea.sflag [#allocation4], %s1251_s16 }
 0x44b   : > { %p1557_p0 = pnand %p2240_p1, %p2239_p9 }
 0x44d   : > { %1771 = dma.done.wait (!%p1557_p0), %s1252_s14, 64  }
 0x44e   : > { %1773 = vsyncadd (!%p1557_p0), %s1252_s14, 4294967232  ;;  %s1261_s19 = scalar_lea.sflag [#allocation9], %s1251_s16 }
 0x44f   : > { %1775 = dma.done.wait (!%p1557_p0), %s1261_s19, 64  }
 0x450   : > { %1777 = vsyncadd (!%p1557_p0), %s1261_s19, 4294967232  ;;  %p25_p12 = scmp.ge.s32.totalorder %s1902_s13, 4   ;;  %s2241_s24 = smov %s1784_s25 }
 0x451   : > { %s2242_s25 = smov %s1788_s26  ;;  %s2243_s26 = smov %s1936_s18 }
 0x452   : > { %s2244_s27 = smov %s1902_s13  ;;  %27 = sbr.rel (!%p25_p12) target bundleno = 8 (0x8), region = 113 }
 0x459   :  { %1266 = vsyncpa [#allocation3], 1 }
 0x45a   :  { %1268 = vsyncpa [#allocation3 + $0x1], 1 }
 0x45b   :  { %1269 = vsyncpa [#allocation6], 1 }
 0x45c   :  { %1270 = vsyncpa [#allocation4], 1 }
 0x45d   :  { %1272 = vsyncpa [#allocation4 + $0x1], 1 }
 0x45e   :  { %1273 = vsyncpa [#allocation9], 1 }
 0x45f   :  { %1275 = vsyncpa [#allocation9 + $0x1], 1 }

</bundles_post_ra>
